<compile_context>
chip_gen: v5e
topology: v5e:2x2
jax: 0.10.0
libtpu: 0.0.40
codegen_flags: <defaults>
</compile_context>

<pallas_src>
import jax
import jax.numpy as jnp
from jax.experimental import pallas as pl
from jax.experimental.pallas import tpu as pltpu


# --------------------------------------------------------------------------- #
# Kernel
# --------------------------------------------------------------------------- #
def rumor_attention_kernel(x_ref, w1_ref, b1_ref, w2_ref, b2_ref, o_ref):
    # x_ref:  (tm, gF)    w1_ref: (gF, gH)   b1_ref: (1, gH)
    # w2_ref: (gH, gF)    b2_ref: (1, gF)    o_ref:  (tm, gF)
    x = x_ref[...]
    # Linear(F -> H) + ReLU; f32 accumulation on the MXU, bias add in f32.
    h = jnp.dot(x, w1_ref[...], preferred_element_type=jnp.float32) + b1_ref[...]
    h = jnp.maximum(h, 0.0)
    # Linear(H -> F) + Sigmoid; cast h to the weight dtype so bf16 weights hit
    # the MXU natively (no-op when weights are f32), accumulate in f32.
    z = jnp.dot(h.astype(w2_ref.dtype), w2_ref[...],
                preferred_element_type=jnp.float32) + b2_ref[...]
    attn = jax.nn.sigmoid(z)                       # EUP path, f32
    # Elementwise gating in f32, store in the output dtype.
    o_ref[...] = (x.astype(jnp.float32) * attn).astype(o_ref.dtype)


# --------------------------------------------------------------------------- #
# Wrapper
# --------------------------------------------------------------------------- #
def _round_up(n, m):
    return ((n + m - 1) // m) * m


def _default_pack_factor(in_features):
    """Packing factor g so the packed lane width g*F fills the MXU / vregs."""
    try:
        kind = jax.devices()[0].device_kind.lower()
    except Exception:  # pragma: no cover - defensive only
        kind = ""
    target = 128 if "v5" in kind else 256  # v5e MXU is 128 wide; v6e/v7x 256.
    return max(1, min(32, -(-target // max(in_features, 1))))


def rumor_attention(x, w1, b1, w2, b2, *, tm=2048, pack=None, compute_dtype=None):
    """RumorAttention forward.

    x: (N, F); w1: (F, H); b1: (H,); w2: (H, F); b2: (F,)
    (PyTorch Linear weights are (out, in); pass them pre-transposed to (in, out).)
    """
    N, F = x.shape
    H = w1.shape[1]

    g = _default_pack_factor(F) if pack is None else max(1, int(pack))
    gF, gH = g * F, g * H

    if compute_dtype is not None:
        x = x.astype(compute_dtype)
        w1 = w1.astype(compute_dtype)
        w2 = w2.astype(compute_dtype)
    out_dtype = x.dtype
    # Biases and the epilogue stay in f32 (safe on v5e: no bf16 VPU/EUP).
    b1 = b1.astype(jnp.float32)
    b2 = b2.astype(jnp.float32)

    # ---- Lane-dense packing: g rows side-by-side + block-diagonal weights ----
    rows_packed = -(-N // g)
    tm_eff = max(8, min(_round_up(tm, 8), _round_up(rows_packed, 8)))
    rows_pad = _round_up(rows_packed, tm_eff)
    n_pad = rows_pad * g
    if n_pad != N:
        x = jnp.pad(x, ((0, n_pad - N), (0, 0)))
    x_packed = x.reshape(rows_pad, gF)

    if g > 1:
        w1_blk = jax.scipy.linalg.block_diag(*([w1] * g))   # (gF, gH)
        w2_blk = jax.scipy.linalg.block_diag(*([w2] * g))   # (gH, gF)
        b1_blk = jnp.tile(b1, g).reshape(1, gH)
        b2_blk = jnp.tile(b2, g).reshape(1, gF)
    else:
        w1_blk, w2_blk = w1, w2
        b1_blk, b2_blk = b1.reshape(1, H), b2.reshape(1, F)

    grid = (rows_pad // tm_eff,)

    in_isz = jnp.dtype(x_packed.dtype).itemsize
    out_isz = jnp.dtype(out_dtype).itemsize
    w_isz = jnp.dtype(w1_blk.dtype).itemsize

    # VMEM budget: double-buffered x/out tiles + (double-buffered) weights/biases.
    vmem_needed = 2 * tm_eff * gF * (in_isz + out_isz)
    vmem_needed += 2 * (2 * gF * gH * w_isz + (gF + gH) * 4)
    # Leave headroom, cap at 48 MiB so it stays safe on v7x's 64 MiB VMEM.
    vmem_limit = int(min(max(vmem_needed + (4 << 20), 16 << 20), 48 << 20))

    cost = pl.CostEstimate(
        flops=4 * rows_pad * gF * gH,
        transcendentals=rows_pad * gF,
        bytes_accessed=rows_pad * gF * (in_isz + out_isz) + 2 * gF * gH * w_isz,
    )

    out_packed = pl.pallas_call(
        rumor_attention_kernel,
        out_shape=jax.ShapeDtypeStruct((rows_pad, gF), out_dtype),
        grid_spec=pltpu.PrefetchScalarGridSpec(
            num_scalar_prefetch=0,
            grid=grid,
            in_specs=[
                pl.BlockSpec((tm_eff, gF), lambda i: (i, 0)),  # packed x tile
                pl.BlockSpec((gF, gH), lambda i: (0, 0)),      # W1 (block-diag)
                pl.BlockSpec((1, gH), lambda i: (0, 0)),       # b1
                pl.BlockSpec((gH, gF), lambda i: (0, 0)),      # W2 (block-diag)
                pl.BlockSpec((1, gF), lambda i: (0, 0)),       # b2
            ],
            out_specs=pl.BlockSpec((tm_eff, gF), lambda i: (i, 0)),
        ),
        compiler_params=pltpu.CompilerParams(
            dimension_semantics=("parallel",),   # shards rows across v7x's 2 TCs
            vmem_limit_bytes=vmem_limit,
        ),
        cost_estimate=cost,
    )(x_packed, w1_blk, b1_blk, w2_blk, b2_blk)

    return out_packed.reshape(n_pad, F)[:N]


# --------------------------------------------------------------------------- #
# Pure-JAX reference
# --------------------------------------------------------------------------- #
def rumor_attention_ref(x, w1, b1, w2, b2):
    h = jnp.maximum(x @ w1 + b1, 0.0)
    attn = jax.nn.sigmoid(h @ w2 + b2)
    return x * attn


if __name__ == "__main__":
    # Small shapes consistent with the module: N rows, in_features F, hidden F//2.
    N, F = 128, 64
    H = F // 2

    key = jax.random.PRNGKey(0)
    kx, kw1, kb1, kw2, kb2 = jax.random.split(key, 5)

    x = jax.random.normal(kx, (N, F), dtype=jnp.float32)
    # PyTorch Linear weight is (out, in); build the transposed (in, out) layout.
    w1 = jax.random.normal(kw1, (F, H), dtype=jnp.float32) * (1.0 / jnp.sqrt(F))
    b1 = jax.random.normal(kb1, (H,), dtype=jnp.float32) * 0.01
    w2 = jax.random.normal(kw2, (H, F), dtype=jnp.float32) * (1.0 / jnp.sqrt(H))
    b2 = jax.random.normal(kb2, (F,), dtype=jnp.float32) * 0.01

    ref = rumor_attention_ref(x, w1, b1, w2, b2)

    # f32 path (exact semantics of the PyTorch module).
    out = jax.block_until_ready(rumor_attention(x, w1, b1, w2, b2))
    assert out.shape == (N, F)
    assert jnp.allclose(out, ref, atol=1e-5, rtol=1e-5), "f32 mismatch vs reference"

    # Ragged row count (exercises wrapper-side padding instead of a hard assert).
    n_odd = 100
    out_odd = jax.block_until_ready(rumor_attention(x[:n_odd], w1, b1, w2, b2))
    assert out_odd.shape == (n_odd, F)
    assert jnp.allclose(out_odd, ref[:n_odd], atol=1e-5, rtol=1e-5), "ragged mismatch"

    # bf16 I/O path (halves HBM traffic; MXU accumulation stays f32).
    out_bf16 = jax.block_until_ready(
        rumor_attention(x, w1, b1, w2, b2, compute_dtype=jnp.bfloat16))
    assert out_bf16.dtype == jnp.bfloat16
    assert jnp.allclose(out_bf16.astype(jnp.float32), ref, atol=1e-1, rtol=1e-1), \
        "bf16 mismatch vs reference"

    print("KERNEL_OK")
</pallas_src>

<mosaic_0001>
module attributes {stable_mosaic.version = 11 : i64} {
  func.func @rumor_attention_kernel(%arg0: i32, %arg1: memref<32x256xf32, #tpu.memory_space<vmem>>, %arg2: memref<256x128xf32, #tpu.memory_space<vmem>>, %arg3: memref<1x128xf32, #tpu.memory_space<vmem>>, %arg4: memref<128x256xf32, #tpu.memory_space<vmem>>, %arg5: memref<1x256xf32, #tpu.memory_space<vmem>>, %arg6: memref<32x256xf32, #tpu.memory_space<vmem>>) attributes {dimension_semantics = [#tpu.dimension_semantics<parallel>], iteration_bounds = array<i64: 1>, scalar_prefetch = 0 : i64, scratch_operands = 0 : i64, tpu.core_type = #tpu.core_type<tc>, window_params = [{transform_indices = @transform_0, window_bounds = array<i64: 32, 256>}, {pipeline_mode = #tpu.pipeline_mode<synchronous>, transform_indices = @transform_1, window_bounds = array<i64: 256, 128>}, {pipeline_mode = #tpu.pipeline_mode<synchronous>, transform_indices = @transform_2, window_bounds = array<i64: 1, 128>}, {pipeline_mode = #tpu.pipeline_mode<synchronous>, transform_indices = @transform_3, window_bounds = array<i64: 128, 256>}, {pipeline_mode = #tpu.pipeline_mode<synchronous>, transform_indices = @transform_4, window_bounds = array<i64: 1, 256>}, {transform_indices = @transform_5, window_bounds = array<i64: 32, 256>}]} {
    %c0 = arith.constant 0 : index
    %c0_0 = arith.constant 0 : index
    %0 = vector.load %arg1[%c0, %c0_0] : memref<32x256xf32, #tpu.memory_space<vmem>>, vector<32x256xf32>
    %c0_1 = arith.constant 0 : index
    %c0_2 = arith.constant 0 : index
    %1 = vector.load %arg2[%c0_1, %c0_2] : memref<256x128xf32, #tpu.memory_space<vmem>>, vector<256x128xf32>
    %cst = arith.constant dense<0.000000e+00> : vector<32x128xf32>
    %2 = tpu.matmul %0, %1, %cst {dimension_numbers = #tpu.dot_dimension_numbers<[1], [0], [0], [1], [0, 0, 1, 1], [], []>} : vector<32x256xf32>, vector<256x128xf32>, vector<32x128xf32> -> vector<32x128xf32>
    %c0_3 = arith.constant 0 : index
    %c0_4 = arith.constant 0 : index
    %3 = vector.load %arg3[%c0_3, %c0_4] : memref<1x128xf32, #tpu.memory_space<vmem>>, vector<1x128xf32>
    %4 = vector.broadcast %3 : vector<1x128xf32> to vector<32x128xf32>
    %5 = arith.addf %2, %4 : vector<32x128xf32>
    %cst_5 = arith.constant 0.000000e+00 : f32
    %6 = vector.broadcast %cst_5 : f32 to vector<32x128xf32>
    %7 = arith.maximumf %5, %6 : vector<32x128xf32>
    %c0_6 = arith.constant 0 : index
    %c0_7 = arith.constant 0 : index
    %8 = vector.load %arg4[%c0_6, %c0_7] : memref<128x256xf32, #tpu.memory_space<vmem>>, vector<128x256xf32>
    %cst_8 = arith.constant dense<0.000000e+00> : vector<32x256xf32>
    %9 = tpu.matmul %7, %8, %cst_8 {dimension_numbers = #tpu.dot_dimension_numbers<[1], [0], [0], [1], [0, 0, 1, 1], [], []>} : vector<32x128xf32>, vector<128x256xf32>, vector<32x256xf32> -> vector<32x256xf32>
    %c0_9 = arith.constant 0 : index
    %c0_10 = arith.constant 0 : index
    %10 = vector.load %arg5[%c0_9, %c0_10] : memref<1x256xf32, #tpu.memory_space<vmem>>, vector<1x256xf32>
    %11 = vector.broadcast %10 : vector<1x256xf32> to vector<32x256xf32>
    %12 = arith.addf %9, %11 : vector<32x256xf32>
    %13 = arith.negf %12 : vector<32x256xf32>
    %14 = math.exp %13 : vector<32x256xf32>
    %cst_11 = arith.constant 1.000000e+00 : f32
    %15 = vector.broadcast %cst_11 : f32 to vector<32x256xf32>
    %16 = arith.addf %15, %14 : vector<32x256xf32>
    %17 = arith.divf %15, %16 : vector<32x256xf32>
    %18 = arith.mulf %0, %17 : vector<32x256xf32>
    %c0_12 = arith.constant 0 : index
    %c0_13 = arith.constant 0 : index
    %19 = vector.load %arg6[%c0_12, %c0_13] : memref<32x256xf32, #tpu.memory_space<vmem>>, vector<32x256xf32>
    tpu.vector_store %arg6[%c0_12, %c0_13], %18 {strides = array<i32>} : memref<32x256xf32, #tpu.memory_space<vmem>>, vector<32x256xf32>,
    return
  }
  func.func @transform_0(%arg0: i32) -> (i32, i32) {
    %c0_i32 = arith.constant 0 : i32
    %c0_i32_0 = arith.constant 0 : i32
    return %arg0, %c0_i32 : i32, i32
  }
  func.func @transform_1(%arg0: i32) -> (i32, i32) {
    %c0_i32 = arith.constant 0 : i32
    %c0_i32_0 = arith.constant 0 : i32
    %c0_i32_1 = arith.constant 0 : i32
    return %c0_i32, %c0_i32_0 : i32, i32
  }
  func.func @transform_2(%arg0: i32) -> (i32, i32) {
    %c0_i32 = arith.constant 0 : i32
    %c0_i32_0 = arith.constant 0 : i32
    %c0_i32_1 = arith.constant 0 : i32
    return %c0_i32, %c0_i32_0 : i32, i32
  }
  func.func @transform_3(%arg0: i32) -> (i32, i32) {
    %c0_i32 = arith.constant 0 : i32
    %c0_i32_0 = arith.constant 0 : i32
    %c0_i32_1 = arith.constant 0 : i32
    return %c0_i32, %c0_i32_0 : i32, i32
  }
  func.func @transform_4(%arg0: i32) -> (i32, i32) {
    %c0_i32 = arith.constant 0 : i32
    %c0_i32_0 = arith.constant 0 : i32
    %c0_i32_1 = arith.constant 0 : i32
    return %c0_i32, %c0_i32_0 : i32, i32
  }
  func.func @transform_5(%arg0: i32) -> (i32, i32) {
    %c0_i32 = arith.constant 0 : i32
    %c0_i32_0 = arith.constant 0 : i32
    return %arg0, %c0_i32 : i32, i32
  }
}

</mosaic_0001>

<bundles_post_ra>
// kernel: tpu_custom_call.1
= control target key start
LH: loop header
LB: loop body
LE: loop exit
PB: predicated region body
PF: predicated region fallthrough
CT: control target
= control target key end

     0   :  { %10 = vsyncpa [#allocation3], 0  ;;  %s746_s0 = inlined_call_operand.hbm [shape: f32[32,256], index: 0, kind: input, shape index: {}]   ;;  %s747_s1 = inlined_call_operand.hbm [shape: f32[256,128], index: 1, kind: input, shape index: {}]   ;;  %s748_s2 = inlined_call_operand.vmem [shape: f32[1,128], index: 2, kind: input, shape index: {}]   ;;  %s749_s3 = inlined_call_operand.hbm [shape: f32[128,256], index: 3, kind: input, shape index: {}]   ;;  %s750_s4 = inlined_call_operand.vmem [shape: f32[1,256], index: 4, kind: input, shape index: {}]   ;;  %s751_s5 = inlined_call_operand.hbm [shape: f32[32,256], index: 5, kind: output, shape index: {}]  }
   0x1   :  { %11 = vsyncpa [#allocation6], 0  ;;  %s30_s20 = sshll.u32 %s747_s1, 4  ;;  %s31_s20 = int_to_ptr.hbm [resolvable:$true] %s30_s20 }
   0x2   :  { %12 = vsyncpa [#allocation4], 0  ;;  %s609_s21 = smov [#allocation5]   ;;  %s17_s25 = sshll.u32 %s746_s0, 4  ;;  %s18_s25 = int_to_ptr.hbm [resolvable:$true] %s17_s25 }
   0x3   :  { %s32_s22 = sshll.u32 %s609_s21, 4  ;;  %s610_s26 = smov 128   ;;  %s33_s22 = int_to_ptr.vmem [resolvable:$true] %s32_s22 }
   0x4   :  { %s611_s27 = smov 8   ;;  %s612_s28 = smov [#allocation2]  }
   0x5   :  { %38 = dma.hbm_to_vmem [thread:$0]  %s31_s20, 4096, %s33_s22, [#allocation6], %s610_s26, %s610_s26, %s611_s27  }
   0x6   :  { %s19_s29 = sshll.u32 %s612_s28, 4  ;;  %s613_s30 = smov 256   ;;  %s20_s29 = int_to_ptr.vmem [resolvable:$true] %s19_s29 }
   0x7   :  { %s614_s6 = smov 16   ;;  %s45_s8 = sshll.u32 %s749_s3, 4  ;;  %s46_s8 = int_to_ptr.hbm [resolvable:$true] %s45_s8 }
   0x8   :  { %25 = dma.hbm_to_vmem [thread:$0]  %s18_s25, 1024, %s20_s29, [#allocation3], %s613_s30, %s613_s30, %s614_s6  }
   0x9   :  { %s615_s9 = smov [#allocation7]  }
   0xa   :  { %s47_s0 = sshll.u32 %s615_s9, 4  ;;  %s48_s0 = int_to_ptr.vmem [resolvable:$true] %s47_s0 }
   0xb   :  { %53 = dma.hbm_to_vmem [thread:$0]  %s46_s8, 4096, %s48_s0, [#allocation6], %s613_s30, %s613_s30, %s614_s6  }
   0xc   :  { %603 = dma.done.wait [#allocation3], 1024  }
   0xd   :  { %604 = vsyncadd [#allocation3], 4294966272 }
   0xe   :  { %605 = dma.done.wait [#allocation6], 8192  }
   0xf   :  { %606 = vsyncadd [#allocation6], 4294959104  ;;  %v91_v0 = vld [vmem:[#allocation5 + $0x78] sm:$0xff]  ;;  %v90_v1 = vld [vmem:[#allocation5 + $0x70] sm:$0xff]  ;;  %s444_s15 = sshll.u32 %s751_s5, 4  ;;  %s445_s15 = int_to_ptr.hbm [resolvable:$true] %s444_s15 }
  0x10   :  { %v107_v2 = vld [vmem:[#allocation5 + $0xf8] sm:$0xff]  ;;  %112 = vmatpush.msra.mxu0 %v91_v0  ;;  %v106_v3 = vld [vmem:[#allocation5 + $0xf0] sm:$0xff]  ;;  %v89_v4 = vld [vmem:[#allocation5 + $0x68] sm:$0xff] }
  0x11   :  { %141 = vmatpush.msra.mxu1 %v107_v2  ;;  %v105_v5 = vld [vmem:[#allocation5 + $0xe8] sm:$0xff]  ;;  %v88_v6 = vld [vmem:[#allocation5 + $0x60] sm:$0xff]  ;;  %v87_v8 = vld [vmem:[#allocation5 + $0x58] sm:$0xff] }
  0x12   :  { %113 = vmatpush.msra.mxu0 %v90_v1  ;;  %v104_v7 = vld [vmem:[#allocation5 + $0xe0] sm:$0xff]  ;;  %v103_v9 = vld [vmem:[#allocation5 + $0xd8] sm:$0xff]  ;;  %v86_v10 = vld [vmem:[#allocation5 + $0x50] sm:$0xff] }
  0x13   :  { %142 = vmatpush.msra.mxu1 %v106_v3  ;;  %v102_v11 = vld [vmem:[#allocation5 + $0xd0] sm:$0xff]  ;;  %v85_v12 = vld [vmem:[#allocation5 + $0x48] sm:$0xff]  ;;  %v84_v14 = vld [vmem:[#allocation5 + $0x40] sm:$0xff] }
  0x14   :  { %114 = vmatpush.msra.mxu0 %v89_v4  ;;  %v101_v13 = vld [vmem:[#allocation5 + $0xc8] sm:$0xff]  ;;  %v100_v15 = vld [vmem:[#allocation5 + $0xc0] sm:$0xff]  ;;  %v83_v16 = vld [vmem:[#allocation5 + $0x38] sm:$0xff] }
  0x15   :  { %143 = vmatpush.msra.mxu1 %v105_v5  ;;  %v99_v17 = vld [vmem:[#allocation5 + $0xb8] sm:$0xff]  ;;  %v82_v18 = vld [vmem:[#allocation5 + $0x30] sm:$0xff]  ;;  %v81_v20 = vld [vmem:[#allocation5 + $0x28] sm:$0xff] }
  0x16   :  { %115 = vmatpush.msra.mxu0 %v88_v6  ;;  %v98_v19 = vld [vmem:[#allocation5 + $0xb0] sm:$0xff]  ;;  %v97_v21 = vld [vmem:[#allocation5 + $0xa8] sm:$0xff]  ;;  %v80_v22 = vld [vmem:[#allocation5 + $0x20] sm:$0xff] }
  0x17   :  { %144 = vmatpush.msra.mxu1 %v104_v7  ;;  %v96_v23 = vld [vmem:[#allocation5 + $0xa0] sm:$0xff]  ;;  %v79_v24 = vld [vmem:[#allocation5 + $0x18] sm:$0xff]  ;;  %v78_v26 = vld [vmem:[#allocation5 + $0x10] sm:$0xff] }
  0x18   :  { %116 = vmatpush.msra.mxu0 %v87_v8  ;;  %v95_v25 = vld [vmem:[#allocation5 + $0x98] sm:$0xff]  ;;  %v94_v27 = vld [vmem:[#allocation5 + $0x90] sm:$0xff]  ;;  %v202_v30 = vld [vmem:[#allocation7 + $0xe0] sm:$0xff] }
  0x19   :  { %145 = vmatpush.msra.mxu1 %v103_v9  ;;  %v204_v28 = vld [vmem:[#allocation7 + $0xf0] sm:$0xff]  ;;  %v205_v29 = vld [vmem:[#allocation7 + $0xf8] sm:$0xff]  ;;  %v203_v31 = vld [vmem:[#allocation7 + $0xe8] sm:$0xff] }
  0x1a   :  { %117 = vmatpush.msra.mxu0 %v86_v10  ;;  %v77_v32 = vld [vmem:[#allocation5 + $0x8] sm:$0xff]  ;;  %212 = vmatpush.msra.mxu2 %v204_v28  ;;  %v200_v34 = vld [vmem:[#allocation7 + $0xd0] sm:$0xff]  ;;  %v201_v35 = vld [vmem:[#allocation7 + $0xd8] sm:$0xff] }
  0x1b   :  { %146 = vmatpush.msra.mxu1 %v102_v11  ;;  %v93_v33 = vld [vmem:[#allocation5 + $0x88] sm:$0xff]  ;;  %241 = vmatpush.msra.mxu3 %v205_v29  ;;  %v76_v36 = vld [vmem:[#allocation5] sm:$0xff]  ;;  %v196_v42 = vld [vmem:[#allocation7 + $0xb0] sm:$0xff] }
  0x1c   :  { %118 = vmatpush.msra.mxu0 %v85_v12  ;;  %v92_v37 = vld [vmem:[#allocation5 + $0x80] sm:$0xff]  ;;  %213 = vmatpush.msra.mxu2 %v202_v30  ;;  %v664_v39 = vld [vmem:[#allocation2 + $0x8] sm:$0xff]  ;;  %v197_v43 = vld [vmem:[#allocation7 + $0xb8] sm:$0xff] }
  0x1d   :  { %147 = vmatpush.msra.mxu1 %v101_v13  ;;  %242 = vmatpush.msra.mxu3 %v203_v31  ;;  %v662_v38 = vld [vmem:[#allocation2] sm:$0xff]  ;;  %v199_v41 = vld [vmem:[#allocation7 + $0xc8] sm:$0xff]  ;;  %v192_v46 = vld [vmem:[#allocation7 + $0x90] sm:$0xff] }
  0x1e   :  { %119 = vmatpush.msra.mxu0 %v84_v14  ;;  %214 = vmatpush.msra.mxu2 %v200_v34  ;;  %v198_v40 = vld [vmem:[#allocation7 + $0xc0] sm:$0xff]  ;;  %v195_v45 = vld [vmem:[#allocation7 + $0xa8] sm:$0xff]  ;;  %v193_v47 = vld [vmem:[#allocation7 + $0x98] sm:$0xff] }
  0x1f   :  { %148 = vmatpush.msra.mxu1 %v100_v15  ;;  %243 = vmatpush.msra.mxu3 %v201_v35  ;;  %v194_v44 = vld [vmem:[#allocation7 + $0xa0] sm:$0xff]  ;;  %v668_v48 = vld [vmem:[#allocation2 + $0x10] sm:$0xff]  ;;  %v670_v49 = vld [vmem:[#allocation2 + $0x18] sm:$0xff] }
  0x20   :  { %120 = vmatpush.msra.mxu0 %v83_v16  ;;  %215 = vmatpush.msra.mxu2 %v198_v40  ;;  %v190_v50 = vld [vmem:[#allocation7 + $0x80] sm:$0xff]  ;;  %v191_v51 = vld [vmem:[#allocation7 + $0x88] sm:$0xff]  ;;  %v188_v52 = vld [vmem:[#allocation7 + $0x70] sm:$0xff] }
  0x21   :  { %149 = vmatpush.msra.mxu1 %v99_v17  ;;  %244 = vmatpush.msra.mxu3 %v199_v41  ;;  %v189_v53 = vld [vmem:[#allocation7 + $0x78] sm:$0xff]  ;;  %v186_v54 = vld [vmem:[#allocation7 + $0x60] sm:$0xff]  ;;  %v187_v55 = vld [vmem:[#allocation7 + $0x68] sm:$0xff] }
  0x22   :  { %121 = vmatpush.msra.mxu0 %v82_v18  ;;  %216 = vmatpush.msra.mxu2 %v196_v42  ;;  %v184_v56 = vld [vmem:[#allocation7 + $0x50] sm:$0xff]  ;;  %v185_v57 = vld [vmem:[#allocation7 + $0x58] sm:$0xff]  ;;  %v674_v58 = vld [vmem:[#allocation2 + $0x20] sm:$0xff] }
  0x23   :  { %150 = vmatpush.msra.mxu1 %v98_v19  ;;  %245 = vmatpush.msra.mxu3 %v197_v43  ;;  %v676_v59 = vld [vmem:[#allocation2 + $0x28] sm:$0xff]  ;;  %v182_v60 = vld [vmem:[#allocation7 + $0x40] sm:$0xff]  ;;  %v680_v62 = vld [vmem:[#allocation2 + $0x30] sm:$0xff] }
  0x24   :  { %122 = vmatpush.msra.mxu0 %v81_v20  ;;  %217 = vmatpush.msra.mxu2 %v194_v44  ;;  %v183_v61 = vld [vmem:[#allocation7 + $0x48] sm:$0xff]  ;;  %v682_v63 = vld [vmem:[#allocation2 + $0x38] sm:$0xff]  ;;  %v180_v0 = vld [vmem:[#allocation7 + $0x30] sm:$0xff] }
  0x25   :  { %151 = vmatpush.msra.mxu1 %v97_v21  ;;  %246 = vmatpush.msra.mxu3 %v195_v45  ;;  %v181_v1 = vld [vmem:[#allocation7 + $0x38] sm:$0xff]  ;;  %v178_v2 = vld [vmem:[#allocation7 + $0x20] sm:$0xff]  ;;  %v179_v3 = vld [vmem:[#allocation7 + $0x28] sm:$0xff] }
  0x26   :  { %123 = vmatpush.msra.mxu0 %v80_v22  ;;  %218 = vmatpush.msra.mxu2 %v192_v46  ;;  %v176_v4 = vld [vmem:[#allocation7 + $0x10] sm:$0xff]  ;;  %v177_v5 = vld [vmem:[#allocation7 + $0x18] sm:$0xff]  ;;  %v174_v6 = vld [vmem:[#allocation7] sm:$0xff] }
  0x27   :  { %152 = vmatpush.msra.mxu1 %v96_v23  ;;  %247 = vmatpush.msra.mxu3 %v193_v47  ;;  %v175_v7 = vld [vmem:[#allocation7 + $0x8] sm:$0xff]  ;;  %v474_v8 = vld [vmem:[%s748_s2] ss:$0 sm:$0xff] }
  0x28   :  { %124 = vmatpush.msra.mxu0 %v79_v24  ;;  %219 = vmatpush.msra.mxu2 %v190_v50  ;;  %v206_v29 = vld [vmem:[%s750_s4] sm:$0x3]  ;;  %s616_s4 = smov [#allocation8]  }
  0x29   :  { %153 = vmatpush.msra.mxu1 %v95_v25  ;;  %248 = vmatpush.msra.mxu3 %v191_v51  ;;  %v208_v30 = vperm.slane %v206_v29, 0  ;;  %v692_v31 = vperm.slane %v206_v29, 1  ;;  %s442_s12 = sshll.u32 %s616_s4, 4  ;;  %s443_s12 = int_to_ptr.vmem [resolvable:$true] %s442_s12 }
  0x2a   :  { %125 = vmatpush.msra.mxu0 %v78_v26  ;;  %220 = vmatpush.msra.mxu2 %v188_v52 }
  0x2b   :  { %154 = vmatpush.msra.mxu1 %v94_v27  ;;  %249 = vmatpush.msra.mxu3 %v189_v53 }
  0x2c   :  { %126 = vmatpush.msra.mxu0 %v77_v32  ;;  %221 = vmatpush.msra.mxu2 %v186_v54 }
  0x2d   :  { %155 = vmatpush.msra.mxu1 %v93_v33  ;;  %250 = vmatpush.msra.mxu3 %v187_v55 }
  0x2e   :  { %127 = vmatpush.msra.mxu0 %v76_v36  ;;  %222 = vmatpush.msra.mxu2 %v184_v56 }
  0x2f   :  { %156 = vmatpush.msra.mxu1 %v92_v37  ;;  %128 = vmatmul.f32.vlgmr.msra.gmra.mxu0 %v662_v38 }
  0x30   :  { %157 = vmatmul.f32.vlgmr.msra.gmra.mxu1 %v664_v39  ;;  %251 = vmatpush.msra.mxu3 %v185_v57 }
  0x31   :  { %223 = vmatpush.msra.mxu2 %v182_v60 }
  0x32   :  { %252 = vmatpush.msra.mxu3 %v183_v61 }
  0x33   :  { %224 = vmatpush.msra.mxu2 %v180_v0 }
  0x34   :  { %253 = vmatpush.msra.mxu3 %v181_v1 }
  0x35   :  { %225 = vmatpush.msra.mxu2 %v178_v2 }
  0x36   :  { %254 = vmatpush.msra.mxu3 %v179_v3 }
  0x37   :  { %131 = vmatmul.f32.gmra.mxu0 %v668_v48  ;;  %226 = vmatpush.msra.mxu2 %v176_v4 }
  0x38   :  { %160 = vmatmul.f32.gmra.mxu1 %v670_v49  ;;  %255 = vmatpush.msra.mxu3 %v177_v5 }
  0x39   :  { %227 = vmatpush.msra.mxu2 %v174_v6 }
  0x3a   :  { %256 = vmatpush.msra.mxu3 %v175_v7 }
  0x3f   :  { %134 = vmatmul.f32.gmra.mxu0 %v674_v58 }
  0x40   :  { %163 = vmatmul.f32.gmra.mxu1 %v676_v59 }
  0x47   :  { %137 = vmatmul.f32.gmra.mxu0 %v680_v62 }
  0x48   :  { %166 = vmatmul.f32.gmra.mxu1 %v682_v63 }
  0xac   :  { %v129_v9 = vpop.f32.mrf.mxu0 }
  0xad   :  { %v158_v10 = vpop.f32.mrf.mxu1  ;;  %v130_v11 = vadd.f32 %v474_v8, %v129_v9 }
  0xaf   :  { %v159_v12 = vadd.f32 %v158_v10, %v130_v11 }
  0xb1   :  { %v170_v13 = vmax.f32 %v159_v12, 0.0 }
  0xb3   :  { %228 = vmatmul.f32.vlgmr.msra.gmra.mxu2 %v170_v13  ;;  %257 = vmatmul.f32.vlgmr.msra.gmra.mxu3 %v170_v13 }
  0xb4   :  { %v132_v14 = vpop.f32.mrf.mxu0 }
  0xb5   :  { %v161_v15 = vpop.f32.mrf.mxu1  ;;  %v133_v16 = vadd.f32 %v474_v8, %v132_v14 }
  0xb7   :  { %v162_v17 = vadd.f32 %v161_v15, %v133_v16 }
  0xb9   :  { %v171_v18 = vmax.f32 %v162_v17, 0.0 }
  0xbb   :  { %231 = vmatmul.f32.gmra.mxu2 %v171_v18  ;;  %260 = vmatmul.f32.gmra.mxu3 %v171_v18 }
  0xbc   :  { %v135_v19 = vpop.f32.mrf.mxu0 }
  0xbd   :  { %v164_v20 = vpop.f32.mrf.mxu1  ;;  %v136_v21 = vadd.f32 %v474_v8, %v135_v19 }
  0xbf   :  { %v165_v22 = vadd.f32 %v164_v20, %v136_v21 }
  0xc1   :  { %v172_v23 = vmax.f32 %v165_v22, 0.0 }
  0xc3   :  { %234 = vmatmul.f32.gmra.mxu2 %v172_v23  ;;  %263 = vmatmul.f32.gmra.mxu3 %v172_v23 }
  0xc4   :  { %v138_v24 = vpop.f32.mrf.mxu0 }
  0xc5   :  { %v167_v25 = vpop.f32.mrf.mxu1  ;;  %v139_v26 = vadd.f32 %v474_v8, %v138_v24 }
  0xc7   :  { %v168_v27 = vadd.f32 %v167_v25, %v139_v26 }
  0xc9   :  { %v173_v28 = vmax.f32 %v168_v27, 0.0 }
  0xcb   :  { %237 = vmatmul.f32.gmra.mxu2 %v173_v28  ;;  %266 = vmatmul.f32.gmra.mxu3 %v173_v28 }
 0x136   :  { %v229_v32 = vpop.f32.mrf.mxu2  ;;  %v258_v33 = vpop.f32.mrf.mxu3 }
 0x137   :  { %v230_v34 = vadd.f32 %v229_v32, %v208_v30  ;;  %v259_v35 = vadd.f32 %v258_v33, %v692_v31 }
 0x139   :  { %v458_v36 = vmul.f32 -1.442695, %v230_v34  ;;  %v459_v37 = vmul.f32 -1.442695, %v259_v35 }
 0x13b   :  { %475 = vpow2.f32 %v458_v36 }
 0x13c   :  { %477 = vpow2.f32 %v459_v37 }
 0x13e   :  { %v232_v40 = vpop.f32.mrf.mxu2  ;;  %v261_v41 = vpop.f32.mrf.mxu3 }
 0x13f   :  { %v233_v42 = vadd.f32 %v232_v40, %v208_v30  ;;  %v262_v43 = vadd.f32 %v261_v41, %v692_v31 }
 0x141   :  { %v476_v44 = vpop.eup %475  ;;  %v460_v45 = vmul.f32 -1.442695, %v233_v42  ;;  %v461_v50 = vmul.f32 -1.442695, %v262_v43 }
 0x142   :  { %v478_v46 = vpop.eup %477  ;;  %v294_v47 = vadd.f32 1.0, %v476_v44 }
 0x143   :  { %v295_v51 = vadd.f32 1.0, %v478_v46  ;;  %479 = vpow2.f32 %v460_v45 }
 0x144   :  { %481 = vrcp.f32 %v294_v47  ;;  %v311_v6 = vand.u32 2147483647, %v294_v47  ;;  %v313_v8 = vand.u32 2147483648, %v294_v47  ;;  %vm307_vm1 = vweird.f32 %v294_v47 }
 0x145   :  { %483 = vrcp.f32 %v295_v51  ;;  %v326_v10 = vand.u32 2147483647, %v295_v51  ;;  %v328_v13 = vand.u32 2147483648, %v295_v51  ;;  %vm322_vm4 = vweird.f32 %v295_v51 }
 0x146   :  { %485 = vpow2.f32 %v461_v50  ;;  %v235_v52 = vpop.f32.mrf.mxu2  ;;  %v264_v53 = vpop.f32.mrf.mxu3  ;;  %vm703_vm3 = vcmp.eq.f32.partialorder %v311_v6, 8.507059e+37  ;;  %v314_v21 = vor.u32 1.1754944e-38, %v313_v8 }
 0x147   :  { %v236_v54 = vadd.f32 %v235_v52, %v208_v30  ;;  %v265_v55 = vadd.f32 %v264_v53, %v692_v31  ;;  %vm327_vm6 = vcmp.eq.f32.partialorder %v326_v10, 8.507059e+37  ;;  %v329_v25 = vor.u32 1.1754944e-38, %v328_v13 }
 0x149   :  { %v480_v56 = vpop.eup %479  ;;  %v462_v57 = vmul.f32 -1.442695, %v236_v54  ;;  %v463_v0 = vmul.f32 -1.442695, %v265_v55 }
 0x14a   :  { %v482_v60 = vpop.eup %481  ;;  %v697_v61 = vadd.f32 1.0, %v480_v56 }
 0x14b   :  { %v484_v1 = vpop.eup %483  ;;  %v303_v2 = vmul.f32 %v482_v60, %v294_v47  ;;  %487 = vpow2.f32 %v462_v57  ;;  %vm308_vm0 = vweird.f32 %v482_v60 }
 0x14c   :  { %v486_v3 = vpop.eup %485  ;;  %v318_v4 = vmul.f32 %v484_v1, %v295_v51  ;;  %489 = vrcp.f32 %v697_v61  ;;  %vm323_vm2 = vweird.f32 %v484_v1  ;;  %vm309_vm5 = vmor %vm307_vm1, %vm308_vm0  ;;  %v343_v37 = vand.u32 2147483648, %v697_v61 }
 0x14d   :  { %v304_v5 = vsub.f32 1.0, %v303_v2  ;;  %v700_v7 = vadd.f32 1.0, %v486_v3  ;;  %491 = vpow2.f32 %v463_v0  ;;  %vm324_vm7 = vmor %vm322_vm4, %vm323_vm2  ;;  %v341_v41 = vand.u32 2147483647, %v697_v61 }
 0x14e   :  { %v319_v9 = vsub.f32 1.0, %v318_v4  ;;  %v238_v11 = vpop.f32.mrf.mxu2  ;;  %v267_v19 = vpop.f32.mrf.mxu3  ;;  %vm337_vm9 = vweird.f32 %v697_v61  ;;  %v344_v46 = vor.u32 1.1754944e-38, %v343_v37 }
 0x14f   :  { %v305_v12 = vmul.f32 %v482_v60, %v304_v5  ;;  %493 = vrcp.f32 %v700_v7  ;;  %v239_v18 = vadd.f32 %v238_v11, %v208_v30  ;;  %v268_v30 = vadd.f32 %v267_v19, %v692_v31 }
 0x150   :  { %v320_v14 = vmul.f32 %v484_v1, %v319_v9  ;;  %v358_v47 = vand.u32 2147483648, %v700_v7  ;;  %v356_v51 = vand.u32 2147483647, %v700_v7  ;;  %vm342_vm12 = vcmp.eq.f32.partialorder %v341_v41, 8.507059e+37 }
 0x151   :  { %v488_v15 = vpop.eup %487  ;;  %v306_v16 = vadd.f32 %v482_v60, %v305_v12  ;;  %v464_v27 = vmul.f32 -1.442695, %v239_v18  ;;  %v465_v31 = vmul.f32 -1.442695, %v268_v30  ;;  %vm352_vm13 = vweird.f32 %v700_v7 }
 0x152   :  { %v490_v20 = vpop.eup %489  ;;  %v321_v22 = vadd.f32 %v484_v1, %v320_v14  ;;  %v707_v23 = vadd.f32 1.0, %v488_v15  ;;  %vm357_vm15 = vcmp.eq.f32.partialorder %v356_v51, 8.507059e+37 }
 0x153   :  { %v310_v24 = vsel %vm309_vm5, %v482_v60, %v306_v16  ;;  %v333_v26 = vmul.f32 %v490_v20, %v697_v61  ;;  %v492_v28 = vpop.eup %491  ;;  %vm338_vm8 = vweird.f32 %v490_v20  ;;  %v359_v60 = vor.u32 1.1754944e-38, %v358_v47 }
 0x154   :  { %v315_v29 = vsel %vm703_vm3, %v314_v21, %v310_v24  ;;  %v325_v32 = vsel %vm324_vm7, %v484_v1, %v321_v22  ;;  %495 = vrcp.f32 %v707_v23  ;;  %v719_v44 = vadd.f32 1.0, %v492_v28  ;;  %vm339_vm10 = vmor %vm337_vm9, %vm338_vm8 }
 0x155   :  { %v494_v33 = vpop.eup %493  ;;  %v422_v34 = vmul.f32 %v315_v29, %v662_v38  ;;  %v330_v35 = vsel %vm327_vm6, %v329_v25, %v325_v32  ;;  %v334_v36 = vsub.f32 1.0, %v333_v26  ;;  %497 = vpow2.f32 %v464_v27 }
 0x156   :  { %v423_v40 = vmul.f32 %v330_v35, %v664_v39  ;;  %v348_v42 = vmul.f32 %v494_v33, %v700_v7  ;;  %499 = vrcp.f32 %v719_v44  ;;  %vm353_vm11 = vweird.f32 %v494_v33 }
 0x157   :  { %430 = vst [vmem:[#allocation8] sm:$0xff] %v422_v34  ;;  %v335_v43 = vmul.f32 %v490_v20, %v334_v36  ;;  %501 = vpow2.f32 %v465_v31  ;;  %vm354_vm14 = vmor %vm352_vm13, %vm353_vm11  ;;  %v373_v1 = vand.u32 2147483648, %v707_v23  ;;  %v371_v6 = vand.u32 2147483647, %v707_v23 }
 0x158   :  { %431 = vst [vmem:[#allocation8 + $0x8] sm:$0xff] %v423_v40  ;;  %v349_v38 = vsub.f32 1.0, %v348_v42  ;;  %vm367_vm1 = vweird.f32 %v707_v23  ;;  %v386_v14 = vand.u32 2147483647, %v719_v44  ;;  %v388_v15 = vand.u32 2147483648, %v719_v44 }
 0x159   :  { %v336_v45 = vadd.f32 %v490_v20, %v335_v43  ;;  %v374_v10 = vor.u32 1.1754944e-38, %v373_v1  ;;  %vm372_vm3 = vcmp.eq.f32.partialorder %v371_v6, 8.507059e+37  ;;  %vm382_vm5 = vweird.f32 %v719_v44 }
 0x15a   :  { %v496_v39 = vpop.eup %495  ;;  %v350_v50 = vmul.f32 %v494_v33, %v349_v38  ;;  %vm387_vm7 = vcmp.eq.f32.partialorder %v386_v14, 8.507059e+37 }
 0x15b   :  { %v340_v52 = vsel %vm339_vm10, %v490_v20, %v336_v45  ;;  %v363_v53 = vmul.f32 %v496_v39, %v707_v23  ;;  %v498_v56 = vpop.eup %497  ;;  %vm368_vm0 = vweird.f32 %v496_v39  ;;  %v389_v20 = vor.u32 1.1754944e-38, %v388_v15 }
 0x15c   :  { %v345_v54 = vsel %vm342_vm12, %v344_v46, %v340_v52  ;;  %v351_v55 = vadd.f32 %v494_v33, %v350_v50  ;;  %v300_v2 = vadd.f32 1.0, %v498_v56  ;;  %v500_v3 = vpop.eup %499  ;;  %vm369_vm2 = vmor %vm367_vm1, %vm368_vm0 }
 0x15d   :  { %v424_v57 = vmul.f32 %v345_v54, %v668_v48  ;;  %v364_v61 = vsub.f32 1.0, %v363_v53  ;;  %v502_v8 = vpop.eup %501  ;;  %v378_v48 = vmul.f32 %v500_v3, %v719_v44  ;;  %vm383_vm4 = vweird.f32 %v500_v3 }
 0x15e   :  { %v355_v0 = vsel %vm354_vm14, %v494_v33, %v351_v55  ;;  %503 = vrcp.f32 %v300_v2  ;;  %v301_v12 = vadd.f32 1.0, %v502_v8  ;;  %vm384_vm6 = vmor %vm382_vm5, %vm383_vm4  ;;  %v401_v27 = vand.u32 2147483647, %v300_v2 }
 0x15f   :  { %432 = vst [vmem:[#allocation8 + $0x10] sm:$0xff] %v424_v57  ;;  %v360_v4 = vsel %vm357_vm15, %v359_v60, %v355_v0  ;;  %v365_v5 = vmul.f32 %v496_v39, %v364_v61  ;;  %v379_v11 = vsub.f32 1.0, %v378_v48  ;;  %v403_v28 = vand.u32 2147483648, %v300_v2 }
 0x160   :  { %v425_v7 = vmul.f32 %v360_v4, %v670_v49  ;;  %505 = vrcp.f32 %v301_v12  ;;  %vm397_vm9 = vweird.f32 %v300_v2  ;;  %vm402_vm11 = vcmp.eq.f32.partialorder %v401_v27, 8.507059e+37 }
 0x161   :  { %v366_v9 = vadd.f32 %v496_v39, %v365_v5  ;;  %v380_v17 = vmul.f32 %v500_v3, %v379_v11  ;;  %v404_v33 = vor.u32 1.1754944e-38, %v403_v28  ;;  %v418_v34 = vand.u32 2147483648, %v301_v12 }
 0x162   :  { %433 = vst [vmem:[#allocation8 + $0x18] sm:$0xff] %v425_v7  ;;  %v416_v37 = vand.u32 2147483647, %v301_v12  ;;  %vm412_vm13 = vweird.f32 %v301_v12 }
 0x163   :  { %v370_v13 = vsel %vm369_vm2, %v496_v39, %v366_v9  ;;  %v381_v19 = vadd.f32 %v500_v3, %v380_v17  ;;  %v419_v42 = vor.u32 1.1754944e-38, %v418_v34 }
 0x164   :  { %v375_v16 = vsel %vm372_vm3, %v374_v10, %v370_v13  ;;  %v504_v18 = vpop.eup %503  ;;  %vm417_vm15 = vcmp.eq.f32.partialorder %v416_v37, 8.507059e+37 }
 0x165   :  { %v426_v49 = vmul.f32 %v375_v16, %v674_v58  ;;  %v393_v21 = vmul.f32 %v504_v18, %v300_v2  ;;  %v385_v22 = vsel %vm384_vm6, %v500_v3, %v381_v19  ;;  %vm398_vm8 = vweird.f32 %v504_v18 }
 0x166   :  { %v390_v23 = vsel %vm387_vm7, %v389_v20, %v385_v22  ;;  %v506_v25 = vpop.eup %505  ;;  %vm399_vm10 = vmor %vm397_vm9, %vm398_vm8 }
 0x167   :  { %434 = vst [vmem:[#allocation8 + $0x20] sm:$0xff] %v426_v49  ;;  %v394_v24 = vsub.f32 1.0, %v393_v21  ;;  %v427_v26 = vmul.f32 %v390_v23, %v676_v59  ;;  %v408_v58 = vmul.f32 %v506_v25, %v301_v12  ;;  %vm413_vm12 = vweird.f32 %v506_v25 }
 0x168   :  { %vm414_vm14 = vmor %vm412_vm13, %vm413_vm12 }
 0x169   :  { %v395_v29 = vmul.f32 %v504_v18, %v394_v24  ;;  %435 = vst [vmem:[#allocation8 + $0x28] sm:$0xff] %v427_v26  ;;  %v409_v30 = vsub.f32 1.0, %v408_v58 }
 0x16b   :  { %v396_v32 = vadd.f32 %v504_v18, %v395_v29  ;;  %v410_v36 = vmul.f32 %v506_v25, %v409_v30 }
 0x16d   :  { %v400_v35 = vsel %vm399_vm10, %v504_v18, %v396_v32  ;;  %v411_v41 = vadd.f32 %v506_v25, %v410_v36 }
 0x16e   :  { %v405_v40 = vsel %vm402_vm11, %v404_v33, %v400_v35 }
 0x16f   :  { %v428_v59 = vmul.f32 %v405_v40, %v680_v62  ;;  %v415_v43 = vsel %vm414_vm14, %v506_v25, %v411_v41 }
 0x170   :  { %v420_v44 = vsel %vm417_vm15, %v419_v42, %v415_v43 }
 0x171   :  { %436 = vst [vmem:[#allocation8 + $0x30] sm:$0xff] %v428_v59  ;;  %v429_v38 = vmul.f32 %v420_v44, %v682_v63 }
 0x173   :  { %437 = vst [vmem:[#allocation8 + $0x38] sm:$0xff] %v429_v38 }
 0x174   :  { %450 = dma.vmem_to_hbm [thread:$0]  %s443_s12, 1024, %s445_s15, [#allocation4], %s613_s30, %s613_s30, %s614_s6  }
 0x175   :  { %607 = dma.done.wait [#allocation4], 1024  }
 0x176   :  { %608 = vsyncadd [#allocation4], 4294966272 }
 0x177   :  { %455 = vsyncpa [#allocation3], 1 }
 0x178   :  { %456 = vsyncpa [#allocation6], 1 }
 0x179   :  { %457 = vsyncpa [#allocation4], 1 }

</bundles_post_ra>
